<compile_context>
chip_gen: v7x
topology: tpu7x:2x2x1
jax: 0.10.0
libtpu: 0.0.40
codegen_flags: <defaults>
</compile_context>

<pallas_src>
import math
import jax
import jax.numpy as jnp
from jax.experimental import pallas as pl
from jax.experimental.pallas import tpu as pltpu


def find_multiple(n: int, k: int) -> int:
    if n % k == 0:
        return n
    return n + k - n % k


def _round_up(n: int, k: int) -> int:
    return (n + k - 1) // k * k


def _ffn_kernel(x_ref, w13_ref, w2_ref, o_ref, acc_ref):
    # x_ref  : (tm, dim_p)        row tile of activations
    # w13_ref: (dim_p, 2*th)      fused [w1 | w3] columns for hidden tile j
    # w2_ref : (th, dim_p)        w2 rows for hidden tile j (already transposed)
    # o_ref  : (tm, dim_p)        output row tile
    # acc_ref: (tm, dim_p) f32    accumulator over hidden tiles
    j = pl.program_id(1)

    @pl.when(j == 0)
    def _():
        acc_ref[...] = jnp.zeros_like(acc_ref)

    # Single fused MXU matmul -> (tm, 2*th); split is a lane-tile-aligned slice.
    h = jnp.dot(x_ref[...], w13_ref[...], preferred_element_type=jnp.float32)
    th = h.shape[-1] // 2
    h1 = h[:, :th]
    h3 = h[:, th:]
    gated = (h1 * jax.nn.sigmoid(h1)) * h3          # SiLU gating on VPU/EUP, f32

    acc_ref[...] += jnp.dot(gated.astype(w2_ref.dtype), w2_ref[...],
                            preferred_element_type=jnp.float32)

    @pl.when(j == pl.num_programs(1) - 1)
    def _():
        o_ref[...] = acc_ref[...].astype(o_ref.dtype)


def feed_forward(x, w1, w3, w2, *, tm=256, th=256, compute_dtype=None):
    """SwiGLU feed-forward.  x: (B, T, dim).  Weights in PyTorch layout.

    Dropout is identity (eval mode / p = 0).
    """
    B, T, dim = x.shape
    hidden = w1.shape[0]
    assert w1.shape == (hidden, dim)
    assert w3.shape == (hidden, dim)
    assert w2.shape == (dim, hidden)

    out_dtype = x.dtype
    if compute_dtype is None:
        compute_dtype = x.dtype
    compute_dtype = jnp.dtype(compute_dtype)
    sub = 16 if compute_dtype == jnp.bfloat16 else 8

    M = B * T

    # Lane-dense padded feature dims (multiples of 128).
    dim_p = _round_up(dim, 128)
    th = max(128, _round_up(min(th, _round_up(hidden, 128)), 128))
    hidden_p = _round_up(hidden, th)
    n_h = hidden_p // th

    # Row tile: as large as requested, clamped to the (padded) row count.
    tm_eff = min(_round_up(tm, sub), _round_up(M, sub))
    M_p = _round_up(M, tm_eff)

    # ---- one-time wrapper-side layout plumbing (outside the kernel) ----
    x2d = x.reshape(M, dim).astype(compute_dtype)
    x_p = jnp.zeros((M_p, dim_p), compute_dtype).at[:M, :dim].set(x2d)

    w1t = jnp.zeros((dim_p, hidden_p), compute_dtype).at[:dim, :hidden].set(
        w1.T.astype(compute_dtype))
    w3t = jnp.zeros((dim_p, hidden_p), compute_dtype).at[:dim, :hidden].set(
        w3.T.astype(compute_dtype))
    # Interleave per hidden tile: for tile j, columns [j*2*th, j*2*th+th) come
    # from w1 and [j*2*th+th, (j+1)*2*th) from w3 -> one contiguous BlockSpec slab.
    w13 = jnp.concatenate(
        [w1t.reshape(dim_p, n_h, th), w3t.reshape(dim_p, n_h, th)], axis=2
    ).reshape(dim_p, 2 * hidden_p)

    w2t = jnp.zeros((hidden_p, dim_p), compute_dtype).at[:hidden, :dim].set(
        w2.T.astype(compute_dtype))

    # ---- cost / VMEM budgeting ----
    itemsize = compute_dtype.itemsize
    out_itemsize = jnp.dtype(out_dtype).itemsize
    flops = 2 * M_p * dim_p * (2 * hidden_p) + 2 * M_p * hidden_p * dim_p
    bytes_accessed = (
        (x_p.size + w13.size + w2t.size) * itemsize + M_p * dim_p * out_itemsize)

    vmem_bytes = (
        2 * tm_eff * dim_p * itemsize        # x tile (double-buffered)
        + 2 * dim_p * 2 * th * itemsize      # w13 tile
        + 2 * th * dim_p * itemsize          # w2 tile
        + 2 * tm_eff * dim_p * out_itemsize  # output tile
        + tm_eff * dim_p * 4                 # f32 accumulator scratch
    )
    vmem_limit = int(min(64 * 1024 * 1024, max(2 * vmem_bytes, 16 * 1024 * 1024)))

    out_p = pl.pallas_call(
        _ffn_kernel,
        out_shape=jax.ShapeDtypeStruct((M_p, dim_p), out_dtype),
        grid_spec=pltpu.PrefetchScalarGridSpec(
            num_scalar_prefetch=0,
            grid=(M_p // tm_eff, n_h),
            in_specs=[
                pl.BlockSpec((tm_eff, dim_p), lambda i, j: (i, 0)),   # x rows
                pl.BlockSpec((dim_p, 2 * th), lambda i, j: (0, j)),   # fused w1|w3
                pl.BlockSpec((th, dim_p), lambda i, j: (j, 0)),       # w2 (pre-T)
            ],
            out_specs=pl.BlockSpec((tm_eff, dim_p), lambda i, j: (i, 0)),
            scratch_shapes=[pltpu.VMEM((tm_eff, dim_p), jnp.float32)],
        ),
        compiler_params=pltpu.CompilerParams(
            dimension_semantics=("parallel", "arbitrary"),
            vmem_limit_bytes=vmem_limit,
        ),
        cost_estimate=pl.CostEstimate(
            flops=flops,
            transcendentals=M_p * hidden_p,
            bytes_accessed=bytes_accessed,
        ),
    )(x_p, w13, w2t)

    # Strip padding.
    return out_p[:M, :dim].reshape(B, T, dim)


if __name__ == "__main__":
    # Config (matches FeedForward.__init__ arithmetic):
    #   dim=32, ffn_dim_multiplier=None, multiple_of=32, ffn_dropout_p=0.0
    dim = 32
    multiple_of = 32
    hidden_dim = 4 * dim
    hidden_dim = int(2 * hidden_dim / 3)                  # 85
    hidden_dim = find_multiple(hidden_dim, multiple_of)   # 96

    B, T = 2, 8

    key = jax.random.PRNGKey(0)
    kx, k1, k3, k2 = jax.random.split(key, 4)

    x = jax.random.normal(kx, (B, T, dim), dtype=jnp.float32)
    # Deterministic init mimicking nn.Linear default (uniform in +/- 1/sqrt(fan_in)).
    w1 = jax.random.uniform(k1, (hidden_dim, dim), jnp.float32,
                            -1.0 / math.sqrt(dim), 1.0 / math.sqrt(dim))
    w3 = jax.random.uniform(k3, (hidden_dim, dim), jnp.float32,
                            -1.0 / math.sqrt(dim), 1.0 / math.sqrt(dim))
    w2 = jax.random.uniform(k2, (dim, hidden_dim), jnp.float32,
                            -1.0 / math.sqrt(hidden_dim), 1.0 / math.sqrt(hidden_dim))

    # Pure-JAX reference.
    h = jax.nn.silu(x @ w1.T) * (x @ w3.T)
    ref = h @ w2.T

    # TODO(synk): training-mode dropout (ffn_dropout_p > 0) not implemented; with
    # p=0 / eval mode nn.Dropout is the identity, which this kernel reproduces.

    # f32 compute path (exact check).
    out_f32 = feed_forward(x, w1, w3, w2, compute_dtype=jnp.float32)
    jax.block_until_ready(out_f32)
    assert jnp.allclose(out_f32, ref, atol=1e-4, rtol=1e-4), "f32 mismatch vs reference"

    # bf16 compute path (f32 accumulation), looser tolerance.
    out_bf16 = feed_forward(x, w1, w3, w2, compute_dtype=jnp.bfloat16)
    jax.block_until_ready(out_bf16)
    assert jnp.allclose(out_bf16, ref, atol=5e-2, rtol=5e-2), "bf16 mismatch vs reference"

    print("KERNEL_OK")
</pallas_src>

<mosaic_0001>
module attributes {stable_mosaic.version = 11 : i64} {
  func.func @_ffn_kernel(%arg0: i32, %arg1: i32, %arg2: memref<16x128xf32, #tpu.memory_space<vmem>>, %arg3: memref<128x256xf32, #tpu.memory_space<vmem>>, %arg4: memref<128x128xf32, #tpu.memory_space<vmem>>, %arg5: memref<16x128xf32, #tpu.memory_space<vmem>>, %arg6: memref<16x128xf32, #tpu.memory_space<vmem>>) attributes {dimension_semantics = [#tpu.dimension_semantics<parallel>, #tpu.dimension_semantics<arbitrary>], iteration_bounds = array<i64: 1, 1>, scalar_prefetch = 0 : i64, scratch_operands = 1 : i64, tpu.core_type = #tpu.core_type<tc>, window_params = [{transform_indices = @transform_0, window_bounds = array<i64: 16, 128>}, {transform_indices = @transform_1, window_bounds = array<i64: 128, 256>}, {transform_indices = @transform_2, window_bounds = array<i64: 128, 128>}, {transform_indices = @transform_3, window_bounds = array<i64: 16, 128>}]} {
    %c0_i32 = arith.constant 0 : i32
    %0 = arith.cmpi eq, %arg1, %c0_i32 : i32
    %1 = arith.extui %0 : i1 to i32
    %c0_i32_0 = arith.constant 0 : i32
    %2 = arith.cmpi ne, %1, %c0_i32_0 : i32
    scf.if %2 {
      %cst_14 = arith.constant 0.000000e+00 : f32
      %23 = vector.broadcast %cst_14 : f32 to vector<16x128xf32>
      %c0_15 = arith.constant 0 : index
      %c0_16 = arith.constant 0 : index
      %24 = vector.load %arg6[%c0_15, %c0_16] : memref<16x128xf32, #tpu.memory_space<vmem>>, vector<16x128xf32>
      tpu.vector_store %arg6[%c0_15, %c0_16], %23 {strides = array<i32>} : memref<16x128xf32, #tpu.memory_space<vmem>>, vector<16x128xf32>,
    } else {
    }
    %c0 = arith.constant 0 : index
    %c0_1 = arith.constant 0 : index
    %3 = vector.load %arg2[%c0, %c0_1] : memref<16x128xf32, #tpu.memory_space<vmem>>, vector<16x128xf32>
    %c0_2 = arith.constant 0 : index
    %c0_3 = arith.constant 0 : index
    %4 = vector.load %arg3[%c0_2, %c0_3] : memref<128x256xf32, #tpu.memory_space<vmem>>, vector<128x256xf32>
    %cst = arith.constant dense<0.000000e+00> : vector<16x256xf32>
    %5 = tpu.matmul %3, %4, %cst {dimension_numbers = #tpu.dot_dimension_numbers<[1], [0], [0], [1], [0, 0, 1, 1], [], []>} : vector<16x128xf32>, vector<128x256xf32>, vector<16x256xf32> -> vector<16x256xf32>
    %6 = vector.extract_strided_slice %5 {offsets = [0, 0], sizes = [16, 128], strides = [1, 1]} : vector<16x256xf32> to vector<16x128xf32>
    %7 = vector.extract_strided_slice %5 {offsets = [0, 128], sizes = [16, 128], strides = [1, 1]} : vector<16x256xf32> to vector<16x128xf32>
    %8 = arith.negf %6 : vector<16x128xf32>
    %9 = math.exp %8 : vector<16x128xf32>
    %cst_4 = arith.constant 1.000000e+00 : f32
    %10 = vector.broadcast %cst_4 : f32 to vector<16x128xf32>
    %11 = arith.addf %10, %9 : vector<16x128xf32>
    %12 = arith.divf %10, %11 : vector<16x128xf32>
    %13 = arith.mulf %6, %12 : vector<16x128xf32>
    %14 = arith.mulf %13, %7 : vector<16x128xf32>
    %c0_5 = arith.constant 0 : index
    %c0_6 = arith.constant 0 : index
    %15 = vector.load %arg6[%c0_5, %c0_6] : memref<16x128xf32, #tpu.memory_space<vmem>>, vector<16x128xf32>
    %c0_7 = arith.constant 0 : index
    %c0_8 = arith.constant 0 : index
    %16 = vector.load %arg4[%c0_7, %c0_8] : memref<128x128xf32, #tpu.memory_space<vmem>>, vector<128x128xf32>
    %cst_9 = arith.constant dense<0.000000e+00> : vector<16x128xf32>
    %17 = tpu.matmul %14, %16, %cst_9 {dimension_numbers = #tpu.dot_dimension_numbers<[1], [0], [0], [1], [0, 0, 1, 1], [], []>} : vector<16x128xf32>, vector<128x128xf32>, vector<16x128xf32> -> vector<16x128xf32>
    %18 = arith.addf %15, %17 : vector<16x128xf32>
    %c0_10 = arith.constant 0 : index
    %c0_11 = arith.constant 0 : index
    %19 = vector.load %arg6[%c0_10, %c0_11] : memref<16x128xf32, #tpu.memory_space<vmem>>, vector<16x128xf32>
    tpu.vector_store %arg6[%c0_10, %c0_11], %18 {strides = array<i32>} : memref<16x128xf32, #tpu.memory_space<vmem>>, vector<16x128xf32>,
    %c0_i32_12 = arith.constant 0 : i32
    %20 = arith.cmpi eq, %arg1, %c0_i32_12 : i32
    %21 = arith.extui %20 : i1 to i32
    %c0_i32_13 = arith.constant 0 : i32
    %22 = arith.cmpi ne, %21, %c0_i32_13 : i32
    scf.if %22 {
      %c0_14 = arith.constant 0 : index
      %c0_15 = arith.constant 0 : index
      %23 = vector.load %arg6[%c0_14, %c0_15] : memref<16x128xf32, #tpu.memory_space<vmem>>, vector<16x128xf32>
      %c0_16 = arith.constant 0 : index
      %c0_17 = arith.constant 0 : index
      %24 = vector.load %arg5[%c0_16, %c0_17] : memref<16x128xf32, #tpu.memory_space<vmem>>, vector<16x128xf32>
      tpu.vector_store %arg5[%c0_16, %c0_17], %23 {strides = array<i32>} : memref<16x128xf32, #tpu.memory_space<vmem>>, vector<16x128xf32>,
    } else {
    }
    return
  }
  func.func @transform_0(%arg0: i32, %arg1: i32) -> (i32, i32) {
    %c0_i32 = arith.constant 0 : i32
    %c0_i32_0 = arith.constant 0 : i32
    return %arg0, %c0_i32 : i32, i32
  }
  func.func @transform_1(%arg0: i32, %arg1: i32) -> (i32, i32) {
    %c0_i32 = arith.constant 0 : i32
    %c0_i32_0 = arith.constant 0 : i32
    return %c0_i32, %arg1 : i32, i32
  }
  func.func @transform_2(%arg0: i32, %arg1: i32) -> (i32, i32) {
    %c0_i32 = arith.constant 0 : i32
    %c0_i32_0 = arith.constant 0 : i32
    return %arg1, %c0_i32 : i32, i32
  }
  func.func @transform_3(%arg0: i32, %arg1: i32) -> (i32, i32) {
    %c0_i32 = arith.constant 0 : i32
    %c0_i32_0 = arith.constant 0 : i32
    return %arg0, %c0_i32 : i32, i32
  }
}

</mosaic_0001>

<bundles_post_ra>
// kernel: tpu_custom_call.1
= control target key start
LH: loop header
LB: loop body
LE: loop exit
PB: predicated region body
PF: predicated region fallthrough
CT: control target
= control target key end

     0   :  { %8 = vsyncpa [#allocation4], 0  ;;  %s629_s0 = inlined_call_operand.hbm [shape: f32[16,128], index: 0, kind: input, shape index: {}]   ;;  %s630_s1 = inlined_call_operand.hbm [shape: f32[128,256], index: 1, kind: input, shape index: {}]   ;;  %s631_s2 = inlined_call_operand.hbm [shape: f32[128,128], index: 2, kind: input, shape index: {}]   ;;  %s632_s3 = inlined_call_operand.hbm [shape: f32[16,128], index: 3, kind: output, shape index: {}]  }
   0x1   :  { %9 = vsyncpa [#allocation7], 0 }
   0x2   :  { %10 = vsyncpa [#allocation5], 0  ;;  %s541_s12 = smov [#allocation6]   ;;  %s447_s16 = scalar_lea.hbm %s630_s1, 4096 }
   0x3   :  { %s28_s13 = sshll.u32 %s541_s12, 4  ;;  %p448_p0 = scmp.ne.s32.totalorder %s630_s1, %s447_s16  ;;  %s29_s13 = int_to_ptr.vmem [resolvable:$true] %s28_s13 }
   0x4   :  { %p451_p1 = scmp.lt.u32.totalorder %s447_s16, %s630_s1 }
   0x6   :  { %p453_p2 = pnand %p451_p1, %p448_p0 }
   0x8   :  { %456 = shalt.err (!%p453_p2)
}
   0x9   :  { %s457_s21 = scalar_lea.vmem %s29_s13, 4096  ;;  %p462_p4 = scmp.lt.s32.totalorder %s29_s13, %s29_s13 }
   0xa   :  { %p458_p3 = scmp.ne.s32.totalorder %s29_s13, %s457_s21  ;;  %p463_p5 = scmp.lt.s32.totalorder %s457_s21, %s457_s21 }
   0xc   :  { %p464_p6 = por %p463_p5, %p462_p4 }
   0xe   :  { %p465_p7 = pnand %p464_p6, %p458_p3 }
  0x10   :  { %468 = shalt.err (!%p465_p7)
}
  0x11   :  { %s542_s22 = smov 256   ;;  %s543_s23 = smov 16  }
  0x12   :  { %34 = dma.hbm_to_vmem [thread:$0]  %s630_s1, 4096, %s29_s13, [#allocation7], %s542_s22, %s542_s22, %s543_s23  }
  0x13   :  { %s544_s26 = smov [#allocation3]   ;;  %s469_s30 = scalar_lea.hbm %s629_s0, 256 }
  0x14   :  { %s16_s27 = sshll.u32 %s544_s26, 4  ;;  %p470_p8 = scmp.ne.s32.totalorder %s629_s0, %s469_s30  ;;  %s17_s27 = int_to_ptr.vmem [resolvable:$true] %s16_s27 }
  0x15   :  { %p473_p9 = scmp.lt.u32.totalorder %s469_s30, %s629_s0 }
  0x17   :  { %p475_p10 = pnand %p473_p9, %p470_p8 }
  0x19   :  { %478 = shalt.err (!%p475_p10)
}
  0x1a   :  { %s479_s8 = scalar_lea.vmem %s17_s27, 256  ;;  %p484_p12 = scmp.lt.s32.totalorder %s17_s27, %s17_s27 }
  0x1b   :  { %p480_p11 = scmp.ne.s32.totalorder %s17_s27, %s479_s8  ;;  %p485_p13 = scmp.lt.s32.totalorder %s479_s8, %s479_s8 }
  0x1d   :  { %p486_p0 = por %p485_p13, %p484_p12 }
  0x1f   :  { %p487_p1 = pnand %p486_p0, %p480_p11 }
  0x21   :  { %490 = shalt.err (!%p487_p1)
}
  0x22   :  { %s545_s1 = smov 128   ;;  %s546_s9 = smov 8  }
  0x23   :  { %22 = dma.hbm_to_vmem [thread:$0]  %s629_s0, 256, %s17_s27, [#allocation4], %s545_s1, %s545_s1, %s546_s9  }
  0x24   :  { %s547_s12 = smov [#allocation8]   ;;  %s491_s16 = scalar_lea.hbm %s631_s2, 2048 }
  0x25   :  { %s40_s13 = sshll.u32 %s547_s12, 4  ;;  %p492_p2 = scmp.ne.s32.totalorder %s631_s2, %s491_s16  ;;  %s41_s13 = int_to_ptr.vmem [resolvable:$true] %s40_s13 }
  0x26   :  { %p495_p3 = scmp.lt.u32.totalorder %s491_s16, %s631_s2 }
  0x28   :  { %p497_p4 = pnand %p495_p3, %p492_p2 }
  0x2a   :  { %500 = shalt.err (!%p497_p4)
}
  0x2b   :  { %s501_s21 = scalar_lea.vmem %s41_s13, 2048  ;;  %p506_p6 = scmp.lt.s32.totalorder %s41_s13, %s41_s13 }
  0x2c   :  { %p502_p5 = scmp.ne.s32.totalorder %s41_s13, %s501_s21  ;;  %p507_p7 = scmp.lt.s32.totalorder %s501_s21, %s501_s21 }
  0x2e   :  { %p508_p8 = por %p507_p7, %p506_p6 }
  0x30   :  { %p509_p9 = pnand %p508_p8, %p502_p5 }
  0x32   :  { %512 = shalt.err (!%p509_p9)
}
  0x33   :  { %46 = dma.hbm_to_vmem [thread:$0]  %s631_s2, 2048, %s41_s13, [#allocation7], %s545_s1, %s545_s1, %s546_s9  }
  0x34   :  { %535 = dma.done.wait [#allocation4], 256  }
  0x35   :  { %536 = vsyncadd [#allocation4], 4294967040 }
  0x36   :  { %537 = dma.done.wait [#allocation7], 6144  }
  0x37   :  { %538 = vsyncadd [#allocation7], 4294961152  ;;  %v548_v0 = vmov 0.0   ;;  %v65_v1 = vld [vmem:[#allocation6 + $0x8] sm:$0xff]  ;;  %v67_v2 = vld [vmem:[#allocation6 + $0x18] sm:$0xff]  ;;  %s549_s2 = smov [#allocation9]  }
  0x38   :  { %160 = vmatprep.mubr.f32.mxu0 %v548_v0  ;;  %v64_v3 = vld [vmem:[#allocation6] sm:$0xff]  ;;  %v366_v4 = vpack.c.bf16 %v67_v2, %v65_v1  ;;  %v66_v5 = vld [vmem:[#allocation6 + $0x10] sm:$0xff]  ;;  %v69_v6 = vld [vmem:[#allocation6 + $0x28] sm:$0xff]  ;;  %s298_s23 = sshll.u32 %s549_s2, 4  ;;  %s299_s23 = int_to_ptr.vmem [resolvable:$true] %s298_s23 }
  0x39   :  { %v71_v7 = vld [vmem:[#allocation6 + $0x38] sm:$0xff]  ;;  %v368_v8 = vpack.c.bf16 %v66_v5, %v64_v3  ;;  %v68_v10 = vld [vmem:[#allocation6 + $0x20] sm:$0xff]  ;;  %v70_v11 = vld [vmem:[#allocation6 + $0x30] sm:$0xff]  ;;  %s513_s24 = scalar_lea.vmem %s299_s23, 256  ;;  %p518_p11 = scmp.lt.s32.totalorder %s299_s23, %s299_s23 }
  0x3a   :  { %v370_v9 = vpack.c.bf16 %v71_v7, %v69_v6  ;;  %v73_v12 = vld [vmem:[#allocation6 + $0x48] sm:$0xff]  ;;  %367 = vmatprep.subr.bf16.mxu0 %v366_v4  ;;  %v75_v13 = vld [vmem:[#allocation6 + $0x58] sm:$0xff]  ;;  %v372_v14 = vpack.c.bf16 %v70_v11, %v68_v10  ;;  %v72_v16 = vld [vmem:[#allocation6 + $0x40] sm:$0xff]  ;;  %p514_p10 = scmp.ne.s32.totalorder %s299_s23, %s513_s24  ;;  %p519_p12 = scmp.lt.s32.totalorder %s513_s24, %s513_s24 }
  0x3b   :  { %369 = vmatpush1.bf16.msra.mxu0 %v368_v8  ;;  %v374_v15 = vpack.c.bf16 %v75_v13, %v73_v12  ;;  %v74_v17 = vld [vmem:[#allocation6 + $0x50] sm:$0xff]  ;;  %v77_v18 = vld [vmem:[#allocation6 + $0x68] sm:$0xff]  ;;  %v79_v19 = vld [vmem:[#allocation6 + $0x78] sm:$0xff] }
  0x3c   :  { %371 = vmatprep.subr.bf16.mxu0 %v370_v9  ;;  %v376_v20 = vpack.c.bf16 %v74_v17, %v72_v16  ;;  %v378_v21 = vpack.c.bf16 %v79_v19, %v77_v18  ;;  %v76_v22 = vld [vmem:[#allocation6 + $0x60] sm:$0xff]  ;;  %v78_v23 = vld [vmem:[#allocation6 + $0x70] sm:$0xff]  ;;  %v81_v24 = vld [vmem:[#allocation6 + $0x88] sm:$0xff]  ;;  %p520_p13 = por %p519_p12, %p518_p11 }
  0x3d   :  { %v83_v25 = vld [vmem:[#allocation6 + $0x98] sm:$0xff]  ;;  %v380_v26 = vpack.c.bf16 %v78_v23, %v76_v22  ;;  %v80_v28 = vld [vmem:[#allocation6 + $0x80] sm:$0xff]  ;;  %v82_v29 = vld [vmem:[#allocation6 + $0x90] sm:$0xff] }
  0x3e   :  { %v382_v27 = vpack.c.bf16 %v83_v25, %v81_v24  ;;  %v85_v30 = vld [vmem:[#allocation6 + $0xa8] sm:$0xff]  ;;  %v87_v31 = vld [vmem:[#allocation6 + $0xb8] sm:$0xff]  ;;  %v384_v32 = vpack.c.bf16 %v82_v29, %v80_v28  ;;  %v84_v34 = vld [vmem:[#allocation6 + $0xa0] sm:$0xff]  ;;  %p521_p0 = pnand %p520_p13, %p514_p10 }
  0x3f   :  { %373 = vmatpush1.bf16.msra.mxu0 %v372_v14  ;;  %v386_v33 = vpack.c.bf16 %v87_v31, %v85_v30  ;;  %v86_v35 = vld [vmem:[#allocation6 + $0xb0] sm:$0xff]  ;;  %v89_v36 = vld [vmem:[#allocation6 + $0xc8] sm:$0xff]  ;;  %v91_v37 = vld [vmem:[#allocation6 + $0xd8] sm:$0xff] }
  0x40   :  { %375 = vmatprep.subr.bf16.mxu0 %v374_v15  ;;  %v388_v38 = vpack.c.bf16 %v86_v35, %v84_v34  ;;  %v390_v39 = vpack.c.bf16 %v91_v37, %v89_v36  ;;  %v88_v40 = vld [vmem:[#allocation6 + $0xc0] sm:$0xff]  ;;  %v90_v41 = vld [vmem:[#allocation6 + $0xd0] sm:$0xff]  ;;  %v93_v42 = vld [vmem:[#allocation6 + $0xe8] sm:$0xff] }
  0x41   :  { %v95_v43 = vld [vmem:[#allocation6 + $0xf8] sm:$0xff]  ;;  %v392_v44 = vpack.c.bf16 %v90_v41, %v88_v40  ;;  %v92_v46 = vld [vmem:[#allocation6 + $0xe0] sm:$0xff]  ;;  %v94_v47 = vld [vmem:[#allocation6 + $0xf0] sm:$0xff] }
  0x42   :  { %v394_v45 = vpack.c.bf16 %v95_v43, %v93_v42  ;;  %v396_v48 = vpack.c.bf16 %v94_v47, %v92_v46  ;;  %v62_v49 = vld [vmem:[#allocation3] sm:$0xff]  ;;  %v63_v50 = vld [vmem:[#allocation3 + $0x8] sm:$0xff]  ;;  %v191_v51 = vld [vmem:[#allocation8] sm:$0xff] }
  0x43   :  { %377 = vmatpush1.bf16.msra.mxu0 %v376_v20  ;;  %v192_v52 = vld [vmem:[#allocation8 + $0x8] sm:$0xff]  ;;  %v193_v54 = vld [vmem:[#allocation8 + $0x10] sm:$0xff]  ;;  %v194_v55 = vld [vmem:[#allocation8 + $0x18] sm:$0xff] }
  0x44   :  { %379 = vmatprep.subr.bf16.mxu0 %v378_v21  ;;  %v398_v53 = vpack.c.bf16 %v192_v52, %v191_v51  ;;  %v402_v56 = vpack.c.bf16 %v194_v55, %v193_v54  ;;  %v195_v57 = vld [vmem:[#allocation8 + $0x20] sm:$0xff]  ;;  %v196_v58 = vld [vmem:[#allocation8 + $0x28] sm:$0xff]  ;;  %v197_v60 = vld [vmem:[#allocation8 + $0x30] sm:$0xff] }
  0x45   :  { %v406_v59 = vpack.c.bf16 %v196_v58, %v195_v57  ;;  %v198_v61 = vld [vmem:[#allocation8 + $0x38] sm:$0xff]  ;;  %v199_v63 = vld [vmem:[#allocation8 + $0x40] sm:$0xff]  ;;  %v201_v2 = vld [vmem:[#allocation8 + $0x50] sm:$0xff] }
  0x46   :  { %399 = vmatprep.subr.bf16.mxu1 %v398_v53  ;;  %v410_v62 = vpack.c.bf16 %v198_v61, %v197_v60  ;;  %v202_v3 = vld [vmem:[#allocation8 + $0x58] sm:$0xff]  ;;  %v203_v5 = vld [vmem:[#allocation8 + $0x60] sm:$0xff]  ;;  %v204_v6 = vld [vmem:[#allocation8 + $0x68] sm:$0xff] }
  0x47   :  { %381 = vmatpush1.bf16.msra.mxu0 %v380_v26  ;;  %401 = vmatpush3.bf16.msra.mxu1 %v398_v53  ;;  %v418_v4 = vpack.c.bf16 %v202_v3, %v201_v2  ;;  %v422_v7 = vpack.c.bf16 %v204_v6, %v203_v5  ;;  %v205_v8 = vld [vmem:[#allocation8 + $0x70] sm:$0xff]  ;;  %v206_v9 = vld [vmem:[#allocation8 + $0x78] sm:$0xff] }
  0x48   :  { %383 = vmatprep.subr.bf16.mxu0 %v382_v27  ;;  %403 = vmatprep.subr.bf16.mxu1 %v402_v56  ;;  %v426_v10 = vpack.c.bf16 %v206_v9, %v205_v8 }
  0x4b   :  { %385 = vmatpush1.bf16.msra.mxu0 %v384_v32  ;;  %405 = vmatpush3.bf16.msra.mxu1 %v402_v56 }
  0x4c   :  { %387 = vmatprep.subr.bf16.mxu0 %v386_v33  ;;  %407 = vmatprep.subr.bf16.mxu1 %v406_v59 }
  0x4f   :  { %389 = vmatpush1.bf16.msra.mxu0 %v388_v38  ;;  %409 = vmatpush3.bf16.msra.mxu1 %v406_v59 }
  0x50   :  { %391 = vmatprep.subr.bf16.mxu0 %v390_v39  ;;  %411 = vmatprep.subr.bf16.mxu1 %v410_v62 }
  0x53   :  { %393 = vmatpush1.bf16.msra.mxu0 %v392_v44  ;;  %413 = vmatpush3.bf16.msra.mxu1 %v410_v62 }
  0x54   :  { %395 = vmatprep.subr.bf16.mxu0 %v394_v45 }
  0x57   :  { %397 = vmatpush1.bf16.msra.mxu0 %v396_v48 }
  0x5a   :  { %161 = vmatmul.mubr.f32.vlgmr.msra.gmra.mrb[0].mxu0 %v62_v49 }
  0x5b   :  { %166 = vmatprep.mubr.f32.mxu0 %v548_v0  ;;  %v200_v0 = vld [vmem:[#allocation8 + $0x48] sm:$0xff] }
  0x5c   :  { %v414_v1 = vpack.c.bf16 %v200_v0, %v199_v63 }
  0x5e   :  { %167 = vmatmul.mubr.f32.gmra.mrb[2].mxu0 %v63_v50  ;;  %415 = vmatprep.subr.bf16.mxu1 %v414_v1 }
  0x5f   :  { %417 = vmatpush3.bf16.msra.mxu1 %v414_v1 }
  0x60   :  { %419 = vmatprep.subr.bf16.mxu1 %v418_v4 }
  0x63   :  { %421 = vmatpush3.bf16.msra.mxu1 %v418_v4 }
  0x64   :  { %423 = vmatprep.subr.bf16.mxu1 %v422_v7 }
  0x67   :  { %425 = vmatpush3.bf16.msra.mxu1 %v422_v7 }
  0x68   :  { %427 = vmatprep.subr.bf16.mxu1 %v426_v10 }
  0x6b   :  { %429 = vmatpush3.bf16.msra.mxu1 %v426_v10 }
 0x12d   :  { %v162_v11 = vpop.f32.mrb[0].mxu0 }
 0x12e   :  { %v311_v12 = vmul.f32 -1.442695, %v162_v11  ;;  %v164_v13 = vpop.f32.mrb[1].mxu0 }
 0x130   :  { %439 = vpow2.f32 %v311_v12 }
 0x131   :  { %v168_v14 = vpop.f32.mrb[2].mxu0 }
 0x132   :  { %v312_v15 = vmul.f32 -1.442695, %v168_v14  ;;  %v170_v16 = vpop.f32.mrb[3].mxu0 }
 0x134   :  { %441 = vpow2.f32 %v312_v15 }
 0x13a   :  { %v440_v17 = vpop.eup %439 }
 0x13b   :  { %v179_v18 = vadd.f32 1.0, %v440_v17 }
 0x13d   :  { %443 = vrcp.f32 %v179_v18 }
 0x13e   :  { %v442_v19 = vpop.eup %441 }
 0x13f   :  { %v180_v20 = vadd.f32 1.0, %v442_v19 }
 0x141   :  { %445 = vrcp.f32 %v180_v20 }
 0x147   :  { %v444_v21 = vpop.eup %443 }
 0x148   :  { %v185_v22 = vmul.f32 %v444_v21, %v162_v11 }
 0x14a   :  { %v187_v23 = vmul.f32 %v185_v22, %v164_v13 }
 0x14b   :  { %v446_v24 = vpop.eup %445 }
 0x14c   :  { %v186_v25 = vmul.f32 %v446_v24, %v168_v14  ;;  %363 = vmatprep.mubr.f32.mxu1 %v187_v23 }
 0x14e   :  { %v188_v26 = vmul.f32 %v186_v25, %v170_v16 }
 0x150   :  { %364 = vmatmul.mubr.f32.vlgmr.msra.gmra.mrb[0].mxu1 %v188_v26 }
 0x223   :  { %v365_v27 = vpop.f32.mrb[0].mxu1 }
 0x224   :  { %292 = vst [vmem:[#allocation9 + $0x8] sm:$0xff] %v365_v27  ;;  %v273_v28 = vpop.f32.mrb[1].mxu1 }
 0x225   :  { %291 = vst [vmem:[#allocation9] sm:$0xff] %v273_v28 }
 0x226   :  { %524 = shalt.err (!%p521_p0)
}
 0x227   :  { %s525_s27 = scalar_lea.hbm %s632_s3, 256 }
 0x228   :  { %p526_p1 = scmp.ne.s32.totalorder %s632_s3, %s525_s27  ;;  %p529_p2 = scmp.lt.u32.totalorder %s525_s27, %s632_s3 }
 0x22a   :  { %p531_p3 = pnand %p529_p2, %p526_p1 }
 0x22c   :  { %534 = shalt.err (!%p531_p3)
}
 0x22d   :  { %304 = dma.vmem_to_hbm [thread:$0]  %s299_s23, 256, %s632_s3, [#allocation5], %s545_s1, %s545_s1, %s546_s9  }
 0x22e   :  { %539 = dma.done.wait [#allocation5], 256  }
 0x22f   :  { %540 = vsyncadd [#allocation5], 4294967040 }
 0x230   :  { %308 = vsyncpa [#allocation4], 1 }
 0x231   :  { %309 = vsyncpa [#allocation7], 1 }
 0x232   :  { %310 = vsyncpa [#allocation5], 1 }

</bundles_post_ra>
